<compile_context>
chip_gen: v5e
topology: v5e:2x2
jax: 0.10.0
libtpu: 0.0.40
codegen_flags: <defaults>
</compile_context>

<pallas_src>
import numpy as np
import jax
import jax.numpy as jnp
from jax.experimental import pallas as pl
from jax.experimental.pallas import tpu as pltpu


def _round_up(x, m):
    return ((x + m - 1) // m) * m


# ---------------------------------------------------------------------------
# Primary path: table resident in VMEM, exact dynamic row gather.
# ---------------------------------------------------------------------------
def _embed_vmem_gather_kernel(idx_ref, table_ref, out_ref):
    """idx_ref:   SMEM (Bp,) int32 (scalar prefetch)
       table_ref: VMEM (A, D) — constant index_map, resident across the grid
       out_ref:   VMEM (Bt, D) output block for this grid step"""
    rows = out_ref.shape[0]
    base = pl.program_id(0) * rows
    for r in range(rows):  # unrolled: rows <= block_rows (small, LLO-visible)
        row = idx_ref[base + r]
        out_ref[pl.ds(r, 1), :] = table_ref[pl.ds(row, 1), :]


# ---------------------------------------------------------------------------
# Fallback path: table too large for VMEM -> per-row HBM DMA gather.
# ---------------------------------------------------------------------------
def _embed_dma_gather_kernel(idx_ref, table_ref, out_ref, sem):
    """idx_ref:   SMEM (Bp,) int32 (scalar prefetch)
       table_ref: HBM (A, D) raw ref (memory_space=pl.ANY)
       out_ref:   VMEM (Bt, D) output block for this grid step
       sem:       DMA semaphore pool (nsem,), reused modulo"""
    rows = out_ref.shape[0]
    nsem = sem.shape[0]
    base = pl.program_id(0) * rows

    def _wait(r):
        # Only shape + semaphore matter for .wait(): use a fixed source slice
        # so no extra SMEM index reads happen during the serial drain phase.
        pltpu.make_async_copy(
            table_ref.at[pl.ds(0, 1)],
            out_ref.at[pl.ds(r, 1)],
            sem.at[r % nsem],
        ).wait()

    for r in range(rows):
        if r >= nsem:
            _wait(r - nsem)  # free the semaphore slot we are about to reuse
        pltpu.make_async_copy(
            table_ref.at[pl.ds(idx_ref[base + r], 1)],   # (1, D) table row
            out_ref.at[pl.ds(r, 1)],                     # (1, D) output row
            sem.at[r % nsem],
        ).start()
    for r in range(max(0, rows - nsem), rows):
        _wait(r)
    # TODO(synk): for very large tables, pipeline row DMAs across grid steps
    # via a (2, Bt, D) VMEM scratch instead of the per-step wait-all drain.


# ---------------------------------------------------------------------------
# Wrapper
# ---------------------------------------------------------------------------
def embed_action_pallas(action_input, embedding_table, *,
                        block_rows=128,
                        vmem_table_budget_bytes=8 * 1024 * 1024):
    """action_input: (bs, k) — only column 0 is used (as in the PyTorch module).
       embedding_table: (num_actions, latent_dim).
       returns (bs, latent_dim) == embedding_table[action_input[:, 0].long()]"""
    B = action_input.shape[0]
    A, D = embedding_table.shape
    dtype = embedding_table.dtype
    itemsize = jnp.dtype(dtype).itemsize

    # Clamp ids (PyTorch raises on bad ids; an OOB gather on TPU can fault).
    idx = jnp.clip(action_input[:, 0].astype(jnp.int32), 0, A - 1)

    # Rows per grid step: multiple of the dtype sublane packing (f32->8,
    # bf16->16, int8->32) so the (Bt, D) output block sits on full tiles.
    sub = 8 * max(1, 4 // itemsize)
    bp_min = _round_up(max(B, 1), sub)
    Bt = min(_round_up(block_rows, sub), bp_min)
    # Keep >= 2 grid steps when the batch allows it (v7x: 2 TCs share the grid).
    if bp_min // Bt < 2 and bp_min >= 2 * sub:
        Bt = max(sub, ((bp_min // 2) // sub) * sub)
    Bp = _round_up(B, Bt)
    if Bp != B:
        idx = jnp.concatenate([idx, jnp.zeros((Bp - B,), jnp.int32)])
    grid = (Bp // Bt,)

    table_bytes = A * D * itemsize
    cost = pl.CostEstimate(
        flops=0,
        transcendentals=0,
        bytes_accessed=table_bytes + Bp * 4 + Bp * D * itemsize,
    )
    cparams = pltpu.CompilerParams(dimension_semantics=("parallel",))

    if table_bytes <= vmem_table_budget_bytes:
        # Small table (the EmbedAction case): keep it resident in VMEM and
        # gather with exact dynamic row loads — no per-row DMA descriptors.
        out = pl.pallas_call(
            _embed_vmem_gather_kernel,
            out_shape=jax.ShapeDtypeStruct((Bp, D), dtype),
            grid_spec=pltpu.PrefetchScalarGridSpec(
                num_scalar_prefetch=1,                       # idx -> SMEM
                grid=grid,
                in_specs=[pl.BlockSpec((A, D), lambda i, idx_ref: (0, 0))],
                out_specs=pl.BlockSpec((Bt, D), lambda i, idx_ref: (i, 0)),
            ),
            compiler_params=cparams,
            cost_estimate=cost,
        )(idx, embedding_table)
    else:
        # Large table: leave it in HBM and DMA-gather rows directly into the
        # lane-dense output block, with a capped semaphore pool.
        nsem = min(Bt, 16)
        out = pl.pallas_call(
            _embed_dma_gather_kernel,
            out_shape=jax.ShapeDtypeStruct((Bp, D), dtype),
            grid_spec=pltpu.PrefetchScalarGridSpec(
                num_scalar_prefetch=1,
                grid=grid,
                in_specs=[pl.BlockSpec(memory_space=pl.ANY)],
                out_specs=pl.BlockSpec((Bt, D), lambda i, idx_ref: (i, 0)),
                scratch_shapes=[pltpu.SemaphoreType.DMA((nsem,))],
            ),
            compiler_params=cparams,
            cost_estimate=cost,
        )(idx, embedding_table)

    return out if Bp == B else out[:B]


if __name__ == "__main__":
    # Small shapes consistent with the module: a handful of actions, a
    # lane-dense latent dim, batch of 2.
    num_actions = 12
    latent_dim = 256
    batch = 2

    key = jax.random.PRNGKey(0)
    k_emb, k_idx = jax.random.split(key)

    # nn.Parameter(torch.randn(num_actions, latent_dim))
    action_embedding = jax.random.normal(k_emb, (num_actions, latent_dim), jnp.float32)
    # action ids arrive as a (bs, 1) float tensor in the original pipeline
    idx = jax.random.randint(k_idx, (batch,), 0, num_actions)
    action_input = idx.astype(jnp.float32)[:, None]

    ref = action_embedding[idx]  # pure-JAX reference: embedding lookup

    # Primary (VMEM-resident table) path — exact gather.
    result = jax.block_until_ready(
        embed_action_pallas(action_input, action_embedding))
    np.testing.assert_array_equal(np.asarray(result), np.asarray(ref))

    # Also exercise the HBM DMA-gather fallback (tables too big for VMEM).
    result_dma = jax.block_until_ready(
        embed_action_pallas(action_input, action_embedding,
                            vmem_table_budget_bytes=0))
    np.testing.assert_array_equal(np.asarray(result_dma), np.asarray(ref))

    print("KERNEL_OK")
</pallas_src>

<mosaic_0001>
module attributes {stable_mosaic.version = 11 : i64} {
  func.func @_embed_vmem_gather_kernel(%arg0: i32, %arg1: memref<8xi32, #tpu.memory_space<smem>>, %arg2: memref<12x256xf32, #tpu.memory_space<vmem>>, %arg3: memref<8x256xf32, #tpu.memory_space<vmem>>) attributes {dimension_semantics = [#tpu.dimension_semantics<parallel>], iteration_bounds = array<i64: 1>, scalar_prefetch = 1 : i64, scratch_operands = 0 : i64, tpu.core_type = #tpu.core_type<tc>, window_params = [{pipeline_mode = #tpu.pipeline_mode<synchronous>, transform_indices = @transform_0, window_bounds = array<i64: 12, 256>}, {transform_indices = @transform_1, window_bounds = array<i64: 8, 256>}]} {
    %c8_i32 = arith.constant 8 : i32
    %0 = arith.muli %arg0, %c8_i32 : i32
    %c0_i32 = arith.constant 0 : i32
    %1 = arith.addi %0, %c0_i32 : i32
    %2 = arith.index_cast %1 : i32 to index
    %3 = memref.load %arg1[%2] : memref<8xi32, #tpu.memory_space<smem>>
    %4 = arith.index_cast %3 : i32 to index
    %c0 = arith.constant 0 : index
    %5 = vector.load %arg2[%4, %c0] : memref<12x256xf32, #tpu.memory_space<vmem>>, vector<1x256xf32>
    %c0_0 = arith.constant 0 : index
    %c0_1 = arith.constant 0 : index
    %6 = vector.load %arg3[%c0_0, %c0_1] : memref<8x256xf32, #tpu.memory_space<vmem>>, vector<1x256xf32>
    tpu.vector_store %arg3[%c0_0, %c0_1], %5 {strides = array<i32>} : memref<8x256xf32, #tpu.memory_space<vmem>>, vector<1x256xf32>,
    %c1_i32 = arith.constant 1 : i32
    %7 = arith.addi %0, %c1_i32 : i32
    %8 = arith.index_cast %7 : i32 to index
    %9 = memref.load %arg1[%8] : memref<8xi32, #tpu.memory_space<smem>>
    %10 = arith.index_cast %9 : i32 to index
    %c0_2 = arith.constant 0 : index
    %11 = vector.load %arg2[%10, %c0_2] : memref<12x256xf32, #tpu.memory_space<vmem>>, vector<1x256xf32>
    %c1 = arith.constant 1 : index
    %c0_3 = arith.constant 0 : index
    %12 = vector.load %arg3[%c1, %c0_3] : memref<8x256xf32, #tpu.memory_space<vmem>>, vector<1x256xf32>
    tpu.vector_store %arg3[%c1, %c0_3], %11 {strides = array<i32>} : memref<8x256xf32, #tpu.memory_space<vmem>>, vector<1x256xf32>,
    %c2_i32 = arith.constant 2 : i32
    %13 = arith.addi %0, %c2_i32 : i32
    %14 = arith.index_cast %13 : i32 to index
    %15 = memref.load %arg1[%14] : memref<8xi32, #tpu.memory_space<smem>>
    %16 = arith.index_cast %15 : i32 to index
    %c0_4 = arith.constant 0 : index
    %17 = vector.load %arg2[%16, %c0_4] : memref<12x256xf32, #tpu.memory_space<vmem>>, vector<1x256xf32>
    %c2 = arith.constant 2 : index
    %c0_5 = arith.constant 0 : index
    %18 = vector.load %arg3[%c2, %c0_5] : memref<8x256xf32, #tpu.memory_space<vmem>>, vector<1x256xf32>
    tpu.vector_store %arg3[%c2, %c0_5], %17 {strides = array<i32>} : memref<8x256xf32, #tpu.memory_space<vmem>>, vector<1x256xf32>,
    %c3_i32 = arith.constant 3 : i32
    %19 = arith.addi %0, %c3_i32 : i32
    %20 = arith.index_cast %19 : i32 to index
    %21 = memref.load %arg1[%20] : memref<8xi32, #tpu.memory_space<smem>>
    %22 = arith.index_cast %21 : i32 to index
    %c0_6 = arith.constant 0 : index
    %23 = vector.load %arg2[%22, %c0_6] : memref<12x256xf32, #tpu.memory_space<vmem>>, vector<1x256xf32>
    %c3 = arith.constant 3 : index
    %c0_7 = arith.constant 0 : index
    %24 = vector.load %arg3[%c3, %c0_7] : memref<8x256xf32, #tpu.memory_space<vmem>>, vector<1x256xf32>
    tpu.vector_store %arg3[%c3, %c0_7], %23 {strides = array<i32>} : memref<8x256xf32, #tpu.memory_space<vmem>>, vector<1x256xf32>,
    %c4_i32 = arith.constant 4 : i32
    %25 = arith.addi %0, %c4_i32 : i32
    %26 = arith.index_cast %25 : i32 to index
    %27 = memref.load %arg1[%26] : memref<8xi32, #tpu.memory_space<smem>>
    %28 = arith.index_cast %27 : i32 to index
    %c0_8 = arith.constant 0 : index
    %29 = vector.load %arg2[%28, %c0_8] : memref<12x256xf32, #tpu.memory_space<vmem>>, vector<1x256xf32>
    %c4 = arith.constant 4 : index
    %c0_9 = arith.constant 0 : index
    %30 = vector.load %arg3[%c4, %c0_9] : memref<8x256xf32, #tpu.memory_space<vmem>>, vector<1x256xf32>
    tpu.vector_store %arg3[%c4, %c0_9], %29 {strides = array<i32>} : memref<8x256xf32, #tpu.memory_space<vmem>>, vector<1x256xf32>,
    %c5_i32 = arith.constant 5 : i32
    %31 = arith.addi %0, %c5_i32 : i32
    %32 = arith.index_cast %31 : i32 to index
    %33 = memref.load %arg1[%32] : memref<8xi32, #tpu.memory_space<smem>>
    %34 = arith.index_cast %33 : i32 to index
    %c0_10 = arith.constant 0 : index
    %35 = vector.load %arg2[%34, %c0_10] : memref<12x256xf32, #tpu.memory_space<vmem>>, vector<1x256xf32>
    %c5 = arith.constant 5 : index
    %c0_11 = arith.constant 0 : index
    %36 = vector.load %arg3[%c5, %c0_11] : memref<8x256xf32, #tpu.memory_space<vmem>>, vector<1x256xf32>
    tpu.vector_store %arg3[%c5, %c0_11], %35 {strides = array<i32>} : memref<8x256xf32, #tpu.memory_space<vmem>>, vector<1x256xf32>,
    %c6_i32 = arith.constant 6 : i32
    %37 = arith.addi %0, %c6_i32 : i32
    %38 = arith.index_cast %37 : i32 to index
    %39 = memref.load %arg1[%38] : memref<8xi32, #tpu.memory_space<smem>>
    %40 = arith.index_cast %39 : i32 to index
    %c0_12 = arith.constant 0 : index
    %41 = vector.load %arg2[%40, %c0_12] : memref<12x256xf32, #tpu.memory_space<vmem>>, vector<1x256xf32>
    %c6 = arith.constant 6 : index
    %c0_13 = arith.constant 0 : index
    %42 = vector.load %arg3[%c6, %c0_13] : memref<8x256xf32, #tpu.memory_space<vmem>>, vector<1x256xf32>
    tpu.vector_store %arg3[%c6, %c0_13], %41 {strides = array<i32>} : memref<8x256xf32, #tpu.memory_space<vmem>>, vector<1x256xf32>,
    %c7_i32 = arith.constant 7 : i32
    %43 = arith.addi %0, %c7_i32 : i32
    %44 = arith.index_cast %43 : i32 to index
    %45 = memref.load %arg1[%44] : memref<8xi32, #tpu.memory_space<smem>>
    %46 = arith.index_cast %45 : i32 to index
    %c0_14 = arith.constant 0 : index
    %47 = vector.load %arg2[%46, %c0_14] : memref<12x256xf32, #tpu.memory_space<vmem>>, vector<1x256xf32>
    %c7 = arith.constant 7 : index
    %c0_15 = arith.constant 0 : index
    %48 = vector.load %arg3[%c7, %c0_15] : memref<8x256xf32, #tpu.memory_space<vmem>>, vector<1x256xf32>
    tpu.vector_store %arg3[%c7, %c0_15], %47 {strides = array<i32>} : memref<8x256xf32, #tpu.memory_space<vmem>>, vector<1x256xf32>,
    return
  }
  func.func @transform_0(%arg0: i32, %arg1: memref<8xi32, #tpu.memory_space<smem>>) -> (i32, i32) {
    %c0_i32 = arith.constant 0 : i32
    %c0_i32_0 = arith.constant 0 : i32
    %c0_i32_1 = arith.constant 0 : i32
    return %c0_i32, %c0_i32_0 : i32, i32
  }
  func.func @transform_1(%arg0: i32, %arg1: memref<8xi32, #tpu.memory_space<smem>>) -> (i32, i32) {
    %c0_i32 = arith.constant 0 : i32
    %c0_i32_0 = arith.constant 0 : i32
    return %arg0, %c0_i32 : i32, i32
  }
}

</mosaic_0001>

<bundles_post_ra>
// kernel: tpu_custom_call.1
= control target key start
LH: loop header
LB: loop body
LE: loop exit
PB: predicated region body
PF: predicated region fallthrough
CT: control target
= control target key end

     0   :  { %s292_s12 = smov [#allocation3]   ;;  %s353_s0 = inlined_call_operand.hbm [shape: s32[8], index: 0, kind: input, shape index: {}]   ;;  %s354_s1 = inlined_call_operand.hbm [shape: f32[12,256], index: 1, kind: input, shape index: {}]   ;;  %s355_s2 = inlined_call_operand.hbm [shape: f32[8,256], index: 2, kind: output, shape index: {}]  }
   0x1   :  { %s8_s11 = sshll.u32 %s353_s0, 4  ;;  %s9_s11 = int_to_ptr.hbm [resolvable:$true] %s8_s11 }
   0x2   :  { %11 = dma.hbm_to_smem %s9_s11, 16, %s292_s12, [#allocation2] }
   0x3   :  { %286 = dma.done.wait [#allocation2], 16 }
   0x4   :  { %287 = vsyncadd [#allocation2], 4294967280 }
   0x5   :  { %14 = sfence }
   0x6   :  { %15 = vsyncpa [#allocation5], 0 }
   0x7   :  { %16 = vsyncpa [#allocation6], 0  ;;  %s21_s15 = sshll.u32 %s354_s1, 4  ;;  %s293_s16 = smov [#allocation4]   ;;  %s22_s15 = int_to_ptr.hbm [resolvable:$true] %s21_s15 }
   0x8   :  { %s23_s17 = sshll.u32 %s293_s16, 4  ;;  %s294_s18 = smov 256   ;;  %s24_s17 = int_to_ptr.vmem [resolvable:$true] %s23_s17 }
   0x9   :  { %s295_s19 = smov 16  }
   0xa   :  { %29 = dma.hbm_to_vmem [thread:$0]  %s22_s15, 512, %s24_s17, [#allocation5], %s294_s18, %s294_s18, %s295_s19  }
   0xb   :  { %288 = dma.done.wait [#allocation5], 512  }
   0xc   :  { %289 = vsyncadd [#allocation5], 4294966784  ;;  %s35_s0 = sld [smem:[#allocation3]]  ;;  %v45_v0 = vlaneseq }
   0xd   :  { %s192_s20 = sld [smem:[#allocation3 + $0x1]] }
   0xe   :  { %s195_s21 = sld [smem:[#allocation3 + $0x2]]  ;;  %vm324_vm0 = vcmp.lt.s32.totalorder %v45_v0, 256 }
   0xf   :  { %s318_s22 = sld [smem:[#allocation3 + $0x3]] }
  0x10   :  { %s320_s23 = sld [smem:[#allocation3 + $0x4]] }
  0x11   :  { %s322_s24 = sld [smem:[#allocation3 + $0x5]] }
  0x12   :  { %s36_s1 = sshra.s32 %s35_s0, 3  ;;  %s39_s25 = sand.u32 7, %s35_s0 }
  0x13   :  { %s213_s26 = sshll.u32 %s36_s1, 4  ;;  %s53_s27 = sshra.s32 %s192_s20, 3 }
  0x14   :  { %s42_s28 = sadd.s32 %s213_s26, %s39_s25  ;;  %s56_s29 = sand.u32 7, %s192_s20 }
  0x15   :  { %s214_s30 = sshll.u32 %s53_s27, 4  ;;  %s43_s3 = scalar_lea.vmem [#allocation4], %s42_s28 }
  0x16   :  { %v44_v2 = vld [vmem:[%s43_s3] ss:$8 sm:$0x3]  ;;  %s59_s4 = sadd.s32 %s214_s30, %s56_s29  ;;  %s67_s5 = sshra.s32 %s195_s21, 3 }
  0x17   :  { %49 = vst.msk [vmem:[#allocation7] ss:$8 sm:$0x3] %vm324_vm0, %v44_v2  ;;  %s70_s6 = sand.u32 7, %s195_s21  ;;  %s60_s7 = scalar_lea.vmem [#allocation4], %s59_s4 }
  0x18   :  { %v61_v3 = vld [vmem:[%s60_s7] ss:$8 sm:$0x3]  ;;  %s215_s8 = sshll.u32 %s67_s5, 4  ;;  %s81_s9 = sshra.s32 %s318_s22, 3 }
  0x19   :  { %63 = vst.msk [vmem:[#allocation7 + $0x1] ss:$8 sm:$0x3] %vm324_vm0, %v61_v3  ;;  %s73_s10 = sadd.s32 %s215_s8, %s70_s6  ;;  %s84_s11 = sand.u32 7, %s318_s22 }
  0x1a   :  { %s216_s12 = sshll.u32 %s81_s9, 4  ;;  %s74_s13 = scalar_lea.vmem [#allocation4], %s73_s10 }
  0x1b   :  { %v75_v4 = vld [vmem:[%s74_s13] ss:$8 sm:$0x3]  ;;  %s87_s14 = sadd.s32 %s216_s12, %s84_s11  ;;  %s95_s15 = sshra.s32 %s320_s23, 3 }
  0x1c   :  { %77 = vst.msk [vmem:[#allocation7 + $0x2] ss:$8 sm:$0x3] %vm324_vm0, %v75_v4  ;;  %s98_s16 = sand.u32 7, %s320_s23  ;;  %s88_s17 = scalar_lea.vmem [#allocation4], %s87_s14 }
  0x1d   :  { %v89_v5 = vld [vmem:[%s88_s17] ss:$8 sm:$0x3]  ;;  %s217_s18 = sshll.u32 %s95_s15, 4  ;;  %s109_s19 = sshra.s32 %s322_s24, 3 }
  0x1e   :  { %91 = vst.msk [vmem:[#allocation7 + $0x3] ss:$8 sm:$0x3] %vm324_vm0, %v89_v5  ;;  %s101_s0 = sadd.s32 %s217_s18, %s98_s16  ;;  %s112_s20 = sand.u32 7, %s322_s24 }
  0x1f   :  { %s218_s21 = sshll.u32 %s109_s19, 4  ;;  %s102_s22 = scalar_lea.vmem [#allocation4], %s101_s0 }
  0x20   :  { %v103_v6 = vld [vmem:[%s102_s22] ss:$8 sm:$0x3]  ;;  %s115_s1 = sadd.s32 %s218_s21, %s112_s20  ;;  %s207_s25 = sld [smem:[#allocation3 + $0x6]] }
  0x21   :  { %105 = vst.msk [vmem:[#allocation7 + $0x4] ss:$8 sm:$0x3] %vm324_vm0, %v103_v6  ;;  %s210_s26 = sld [smem:[#allocation3 + $0x7]]  ;;  %s116_s27 = scalar_lea.vmem [#allocation4], %s115_s1 }
  0x22   :  { %v117_v7 = vld [vmem:[%s116_s27] ss:$8 sm:$0x3]  ;;  %s296_s23 = smov [#allocation7]   ;;  %s156_s24 = sshll.u32 %s355_s2, 4  ;;  %s157_s24 = int_to_ptr.hbm [resolvable:$true] %s156_s24 }
  0x23   :  { %119 = vst.msk [vmem:[#allocation7 + $0x5] ss:$8 sm:$0x3] %vm324_vm0, %v117_v7  ;;  %s154_s28 = sshll.u32 %s296_s23, 4  ;;  %s155_s28 = int_to_ptr.vmem [resolvable:$true] %s154_s28 }
  0x26   :  { %s123_s3 = sshra.s32 %s207_s25, 3  ;;  %s126_s4 = sand.u32 7, %s207_s25 }
  0x27   :  { %s219_s5 = sshll.u32 %s123_s3, 4  ;;  %s137_s6 = sshra.s32 %s210_s26, 3 }
  0x28   :  { %s129_s7 = sadd.s32 %s219_s5, %s126_s4  ;;  %s140_s8 = sand.u32 7, %s210_s26 }
  0x29   :  { %s220_s9 = sshll.u32 %s137_s6, 4  ;;  %s130_s10 = scalar_lea.vmem [#allocation4], %s129_s7 }
  0x2a   :  { %v131_v8 = vld [vmem:[%s130_s10] ss:$8 sm:$0x3]  ;;  %s143_s11 = sadd.s32 %s220_s9, %s140_s8 }
  0x2b   :  { %133 = vst.msk [vmem:[#allocation7 + $0x6] ss:$8 sm:$0x3] %vm324_vm0, %v131_v8  ;;  %s144_s12 = scalar_lea.vmem [#allocation4], %s143_s11 }
  0x2c   :  { %v145_v9 = vld [vmem:[%s144_s12] ss:$8 sm:$0x3] }
  0x2d   :  { %147 = vst.msk [vmem:[#allocation7 + $0x7] ss:$8 sm:$0x3] %vm324_vm0, %v145_v9 }
  0x2e   :  { %159 = dma.vmem_to_hbm [thread:$0]  %s155_s28, 256, %s157_s24, [#allocation6]  }
  0x2f   :  { %290 = dma.done.wait [#allocation6], 256  }
  0x30   :  { %291 = vsyncadd [#allocation6], 4294967040 }
  0x31   :  { %164 = vsyncpa [#allocation5], 1 }
  0x32   :  { %165 = vsyncpa [#allocation6], 1 }

</bundles_post_ra>
